<compile_context>
chip_gen: v5e
topology: v5e:2x2
jax: 0.10.0
libtpu: 0.0.40
codegen_flags: <defaults>
</compile_context>

<pallas_src>
import jax
import jax.numpy as jnp
from jax.experimental import pallas as pl
from jax.experimental.pallas import tpu as pltpu

C_IN = 3
C_OUT = 8


def conv1x1_clamp_kernel(w_ref, b_ref, x_ref, o_ref):
    # w_ref: SMEM (C_OUT, C_IN) f32  -- already divided by 6
    # b_ref: SMEM (C_OUT,)      f32  -- already divided by 6
    # x_ref: VMEM (NB, C_IN, H, W)        f32
    # o_ref: VMEM (NB, C_OUT, H+2, W+2)   f32
    nb, _, H, W = x_ref.shape
    Hp, Wp = H + 2, W + 2

    # Hoist the three input channels once per grid step.
    x0 = x_ref[:, 0]            # (NB, H, W)
    x1 = x_ref[:, 1]
    x2 = x_ref[:, 2]

    for co in range(C_OUT):
        w0 = w_ref[co, 0]
        w1 = w_ref[co, 1]
        w2 = w_ref[co, 2]
        b = b_ref[co]

        # Border pixels of Conv2d(kernel=1, padding=1) see only zero-padded
        # input, so their value is bias -> final result clamp(b/6, 0, 1).
        border = jnp.clip(b, 0.0, 1.0)
        o_ref[:, co] = jnp.full((nb, Hp, Wp), border, jnp.float32)

        # Interior: 1x1 conv as 3 scalar-broadcast MACs on the VPU.
        s = x0 * w0 + x1 * w1 + x2 * w2 + b
        o_ref[:, co, 1:H + 1, 1:W + 1] = jnp.clip(s, 0.0, 1.0)


def _pick_batch_block(N, H, W, budget_bytes=4 << 20):
    """Largest NB dividing N whose (input + output) block stays under budget."""
    per_img = 4 * (C_IN * H * W + C_OUT * (H + 2) * (W + 2))
    nb = max(1, min(N, budget_bytes // max(per_img, 1)))
    while N % nb:
        nb -= 1
    return nb


def model_forward(x_nchw, weight, bias):
    """x_nchw: (N, 3, H, W) f32; weight: (8, 3) f32 (1x1 conv); bias: (8,) f32."""
    N, Cin, H, W = x_nchw.shape
    assert Cin == C_IN
    Hp, Wp = H + 2, W + 2
    nb = _pick_batch_block(N, H, W)

    # Fold the final /6 into the parameters (32 scalars on the host side).
    w6 = weight.astype(jnp.float32) * (1.0 / 6.0)
    b6 = bias.astype(jnp.float32) * (1.0 / 6.0)

    return pl.pallas_call(
        conv1x1_clamp_kernel,
        out_shape=jax.ShapeDtypeStruct((N, C_OUT, Hp, Wp), jnp.float32),
        grid=(N // nb,),
        in_specs=[
            pl.BlockSpec(memory_space=pltpu.MemorySpace.SMEM),   # weight (8, 3)
            pl.BlockSpec(memory_space=pltpu.MemorySpace.SMEM),   # bias   (8,)
            pl.BlockSpec((nb, C_IN, H, W), lambda n: (n, 0, 0, 0)),
        ],
        out_specs=pl.BlockSpec((nb, C_OUT, Hp, Wp), lambda n: (n, 0, 0, 0)),
        compiler_params=pltpu.CompilerParams(
            dimension_semantics=("parallel",)),
        cost_estimate=pl.CostEstimate(
            flops=2 * N * H * W * C_IN * C_OUT,
            transcendentals=0,
            bytes_accessed=4 * N * (C_IN * H * W + C_OUT * Hp * Wp)),
    )(w6, b6, x_nchw)


def reference_forward(x_nchw, weight, bias):
    """Pure-JAX reference: pad, 1x1 conv via einsum, clamp, /6."""
    xp = jnp.pad(x_nchw, ((0, 0), (0, 0), (1, 1), (1, 1)))
    v1 = jnp.einsum("nchw,oc->nohw", xp, weight) + bias[None, :, None, None]
    return jnp.clip(v1, 0.0, 6.0) / 6.0


if __name__ == "__main__":
    key = jax.random.PRNGKey(0)
    kx, kw, kb = jax.random.split(key, 3)

    # Small shapes consistent with the module (conv requires 3 input channels).
    N, H, W = 2, 16, 16
    x = jax.random.normal(kx, (N, C_IN, H, W), dtype=jnp.float32)

    # Deterministic PyTorch-style uniform(-1/sqrt(fan_in), +1/sqrt(fan_in)) init.
    bound = 1.0 / (C_IN ** 0.5)
    weight = jax.random.uniform(kw, (C_OUT, C_IN), minval=-bound, maxval=bound,
                                dtype=jnp.float32)
    bias = jax.random.uniform(kb, (C_OUT,), minval=-bound, maxval=bound,
                              dtype=jnp.float32)

    out = jax.block_until_ready(model_forward(x, weight, bias))
    ref = reference_forward(x, weight, bias)

    assert out.shape == (N, C_OUT, H + 2, W + 2), out.shape
    assert jnp.allclose(out, ref, atol=1e-5, rtol=1e-5), float(
        jnp.max(jnp.abs(out - ref)))
    print("KERNEL_OK")
</pallas_src>

<mosaic_0001>
module attributes {stable_mosaic.version = 11 : i64} {
  func.func @conv1x1_clamp_kernel(%arg0: i32, %arg1: memref<8x3xf32, #tpu.memory_space<smem>>, %arg2: memref<8xf32, #tpu.memory_space<smem>>, %arg3: memref<2x3x16x16xf32, #tpu.memory_space<vmem>>, %arg4: memref<2x8x18x18xf32, #tpu.memory_space<vmem>>) attributes {dimension_semantics = [#tpu.dimension_semantics<parallel>], iteration_bounds = array<i64: 1>, scalar_prefetch = 0 : i64, scratch_operands = 0 : i64, tpu.core_type = #tpu.core_type<tc>, window_params = [{transform_indices = @transform_0, window_bounds = array<i64: 8, 3>}, {transform_indices = @transform_1, window_bounds = array<i64: 8>}, {transform_indices = @transform_2, window_bounds = array<i64: 2, 3, 16, 16>}, {transform_indices = @transform_3, window_bounds = array<i64: 2, 8, 18, 18>}]} {
    %c0 = arith.constant 0 : index
    %c0_0 = arith.constant 0 : index
    %c0_1 = arith.constant 0 : index
    %c0_2 = arith.constant 0 : index
    %0 = vector.load %arg3[%c0, %c0_0, %c0_1, %c0_2] : memref<2x3x16x16xf32, #tpu.memory_space<vmem>>, vector<2x1x16x16xf32>
    %1 = vector.shape_cast %0 : vector<2x1x16x16xf32> to vector<2x16x16xf32>
    %c0_3 = arith.constant 0 : index
    %c1 = arith.constant 1 : index
    %c0_4 = arith.constant 0 : index
    %c0_5 = arith.constant 0 : index
    %2 = vector.load %arg3[%c0_3, %c1, %c0_4, %c0_5] : memref<2x3x16x16xf32, #tpu.memory_space<vmem>>, vector<2x1x16x16xf32>
    %3 = vector.shape_cast %2 : vector<2x1x16x16xf32> to vector<2x16x16xf32>
    %c0_6 = arith.constant 0 : index
    %c2 = arith.constant 2 : index
    %c0_7 = arith.constant 0 : index
    %c0_8 = arith.constant 0 : index
    %4 = vector.load %arg3[%c0_6, %c2, %c0_7, %c0_8] : memref<2x3x16x16xf32, #tpu.memory_space<vmem>>, vector<2x1x16x16xf32>
    %5 = vector.shape_cast %4 : vector<2x1x16x16xf32> to vector<2x16x16xf32>
    %c0_9 = arith.constant 0 : index
    %c0_10 = arith.constant 0 : index
    %6 = memref.load %arg1[%c0_9, %c0_10] : memref<8x3xf32, #tpu.memory_space<smem>>
    %c0_11 = arith.constant 0 : index
    %c1_12 = arith.constant 1 : index
    %7 = memref.load %arg1[%c0_11, %c1_12] : memref<8x3xf32, #tpu.memory_space<smem>>
    %c0_13 = arith.constant 0 : index
    %c2_14 = arith.constant 2 : index
    %8 = memref.load %arg1[%c0_13, %c2_14] : memref<8x3xf32, #tpu.memory_space<smem>>
    %c0_15 = arith.constant 0 : index
    %9 = memref.load %arg2[%c0_15] : memref<8xf32, #tpu.memory_space<smem>>
    %cst = arith.constant 0.000000e+00 : f32
    %cst_16 = arith.constant 1.000000e+00 : f32
    %10 = arith.maximumf %cst, %9 : f32
    %11 = arith.minimumf %cst_16, %10 : f32
    %12 = vector.broadcast %11 : f32 to vector<2x18x18xf32>
    %c0_17 = arith.constant 0 : index
    %c0_18 = arith.constant 0 : index
    %c0_19 = arith.constant 0 : index
    %c0_20 = arith.constant 0 : index
    %13 = vector.load %arg4[%c0_17, %c0_18, %c0_19, %c0_20] : memref<2x8x18x18xf32, #tpu.memory_space<vmem>>, vector<2x1x18x18xf32>
    %14 = vector.shape_cast %13 : vector<2x1x18x18xf32> to vector<2x18x18xf32>
    %15 = vector.shape_cast %12 : vector<2x18x18xf32> to vector<2x1x18x18xf32>
    tpu.vector_store %arg4[%c0_17, %c0_18, %c0_19, %c0_20], %15 {strides = array<i32>} : memref<2x8x18x18xf32, #tpu.memory_space<vmem>>, vector<2x1x18x18xf32>,
    %16 = vector.broadcast %6 : f32 to vector<2x16x16xf32>
    %17 = arith.mulf %1, %16 : vector<2x16x16xf32>
    %18 = vector.broadcast %7 : f32 to vector<2x16x16xf32>
    %19 = arith.mulf %3, %18 : vector<2x16x16xf32>
    %20 = arith.addf %17, %19 : vector<2x16x16xf32>
    %21 = vector.broadcast %8 : f32 to vector<2x16x16xf32>
    %22 = arith.mulf %5, %21 : vector<2x16x16xf32>
    %23 = arith.addf %20, %22 : vector<2x16x16xf32>
    %24 = vector.broadcast %9 : f32 to vector<2x16x16xf32>
    %25 = arith.addf %23, %24 : vector<2x16x16xf32>
    %cst_21 = arith.constant 0.000000e+00 : f32
    %cst_22 = arith.constant 1.000000e+00 : f32
    %26 = vector.broadcast %cst_21 : f32 to vector<2x16x16xf32>
    %27 = arith.maximumf %26, %25 : vector<2x16x16xf32>
    %28 = vector.broadcast %cst_22 : f32 to vector<2x16x16xf32>
    %29 = arith.minimumf %28, %27 : vector<2x16x16xf32>
    %c0_23 = arith.constant 0 : index
    %c0_24 = arith.constant 0 : index
    %c1_25 = arith.constant 1 : index
    %c1_26 = arith.constant 1 : index
    %30 = vector.load %arg4[%c0_23, %c0_24, %c1_25, %c1_26] : memref<2x8x18x18xf32, #tpu.memory_space<vmem>>, vector<2x1x16x16xf32>
    %31 = vector.shape_cast %30 : vector<2x1x16x16xf32> to vector<2x16x16xf32>
    %32 = vector.shape_cast %29 : vector<2x16x16xf32> to vector<2x1x16x16xf32>
    tpu.vector_store %arg4[%c0_23, %c0_24, %c1_25, %c1_26], %32 {strides = array<i32>} : memref<2x8x18x18xf32, #tpu.memory_space<vmem>>, vector<2x1x16x16xf32>,
    %c1_27 = arith.constant 1 : index
    %c0_28 = arith.constant 0 : index
    %33 = memref.load %arg1[%c1_27, %c0_28] : memref<8x3xf32, #tpu.memory_space<smem>>
    %c1_29 = arith.constant 1 : index
    %c1_30 = arith.constant 1 : index
    %34 = memref.load %arg1[%c1_29, %c1_30] : memref<8x3xf32, #tpu.memory_space<smem>>
    %c1_31 = arith.constant 1 : index
    %c2_32 = arith.constant 2 : index
    %35 = memref.load %arg1[%c1_31, %c2_32] : memref<8x3xf32, #tpu.memory_space<smem>>
    %c1_33 = arith.constant 1 : index
    %36 = memref.load %arg2[%c1_33] : memref<8xf32, #tpu.memory_space<smem>>
    %cst_34 = arith.constant 0.000000e+00 : f32
    %cst_35 = arith.constant 1.000000e+00 : f32
    %37 = arith.maximumf %cst_34, %36 : f32
    %38 = arith.minimumf %cst_35, %37 : f32
    %39 = vector.broadcast %38 : f32 to vector<2x18x18xf32>
    %c0_36 = arith.constant 0 : index
    %c1_37 = arith.constant 1 : index
    %c0_38 = arith.constant 0 : index
    %c0_39 = arith.constant 0 : index
    %40 = vector.load %arg4[%c0_36, %c1_37, %c0_38, %c0_39] : memref<2x8x18x18xf32, #tpu.memory_space<vmem>>, vector<2x1x18x18xf32>
    %41 = vector.shape_cast %40 : vector<2x1x18x18xf32> to vector<2x18x18xf32>
    %42 = vector.shape_cast %39 : vector<2x18x18xf32> to vector<2x1x18x18xf32>
    tpu.vector_store %arg4[%c0_36, %c1_37, %c0_38, %c0_39], %42 {strides = array<i32>} : memref<2x8x18x18xf32, #tpu.memory_space<vmem>>, vector<2x1x18x18xf32>,
    %43 = vector.broadcast %33 : f32 to vector<2x16x16xf32>
    %44 = arith.mulf %1, %43 : vector<2x16x16xf32>
    %45 = vector.broadcast %34 : f32 to vector<2x16x16xf32>
    %46 = arith.mulf %3, %45 : vector<2x16x16xf32>
    %47 = arith.addf %44, %46 : vector<2x16x16xf32>
    %48 = vector.broadcast %35 : f32 to vector<2x16x16xf32>
    %49 = arith.mulf %5, %48 : vector<2x16x16xf32>
    %50 = arith.addf %47, %49 : vector<2x16x16xf32>
    %51 = vector.broadcast %36 : f32 to vector<2x16x16xf32>
    %52 = arith.addf %50, %51 : vector<2x16x16xf32>
    %cst_40 = arith.constant 0.000000e+00 : f32
    %cst_41 = arith.constant 1.000000e+00 : f32
    %53 = vector.broadcast %cst_40 : f32 to vector<2x16x16xf32>
    %54 = arith.maximumf %53, %52 : vector<2x16x16xf32>
    %55 = vector.broadcast %cst_41 : f32 to vector<2x16x16xf32>
    %56 = arith.minimumf %55, %54 : vector<2x16x16xf32>
    %c0_42 = arith.constant 0 : index
    %c1_43 = arith.constant 1 : index
    %c1_44 = arith.constant 1 : index
    %c1_45 = arith.constant 1 : index
    %57 = vector.load %arg4[%c0_42, %c1_43, %c1_44, %c1_45] : memref<2x8x18x18xf32, #tpu.memory_space<vmem>>, vector<2x1x16x16xf32>
    %58 = vector.shape_cast %57 : vector<2x1x16x16xf32> to vector<2x16x16xf32>
    %59 = vector.shape_cast %56 : vector<2x16x16xf32> to vector<2x1x16x16xf32>
    tpu.vector_store %arg4[%c0_42, %c1_43, %c1_44, %c1_45], %59 {strides = array<i32>} : memref<2x8x18x18xf32, #tpu.memory_space<vmem>>, vector<2x1x16x16xf32>,
    %c2_46 = arith.constant 2 : index
    %c0_47 = arith.constant 0 : index
    %60 = memref.load %arg1[%c2_46, %c0_47] : memref<8x3xf32, #tpu.memory_space<smem>>
    %c2_48 = arith.constant 2 : index
    %c1_49 = arith.constant 1 : index
    %61 = memref.load %arg1[%c2_48, %c1_49] : memref<8x3xf32, #tpu.memory_space<smem>>
    %c2_50 = arith.constant 2 : index
    %c2_51 = arith.constant 2 : index
    %62 = memref.load %arg1[%c2_50, %c2_51] : memref<8x3xf32, #tpu.memory_space<smem>>
    %c2_52 = arith.constant 2 : index
    %63 = memref.load %arg2[%c2_52] : memref<8xf32, #tpu.memory_space<smem>>
    %cst_53 = arith.constant 0.000000e+00 : f32
    %cst_54 = arith.constant 1.000000e+00 : f32
    %64 = arith.maximumf %cst_53, %63 : f32
    %65 = arith.minimumf %cst_54, %64 : f32
    %66 = vector.broadcast %65 : f32 to vector<2x18x18xf32>
    %c0_55 = arith.constant 0 : index
    %c2_56 = arith.constant 2 : index
    %c0_57 = arith.constant 0 : index
    %c0_58 = arith.constant 0 : index
    %67 = vector.load %arg4[%c0_55, %c2_56, %c0_57, %c0_58] : memref<2x8x18x18xf32, #tpu.memory_space<vmem>>, vector<2x1x18x18xf32>
    %68 = vector.shape_cast %67 : vector<2x1x18x18xf32> to vector<2x18x18xf32>
    %69 = vector.shape_cast %66 : vector<2x18x18xf32> to vector<2x1x18x18xf32>
    tpu.vector_store %arg4[%c0_55, %c2_56, %c0_57, %c0_58], %69 {strides = array<i32>} : memref<2x8x18x18xf32, #tpu.memory_space<vmem>>, vector<2x1x18x18xf32>,
    %70 = vector.broadcast %60 : f32 to vector<2x16x16xf32>
    %71 = arith.mulf %1, %70 : vector<2x16x16xf32>
    %72 = vector.broadcast %61 : f32 to vector<2x16x16xf32>
    %73 = arith.mulf %3, %72 : vector<2x16x16xf32>
    %74 = arith.addf %71, %73 : vector<2x16x16xf32>
    %75 = vector.broadcast %62 : f32 to vector<2x16x16xf32>
    %76 = arith.mulf %5, %75 : vector<2x16x16xf32>
    %77 = arith.addf %74, %76 : vector<2x16x16xf32>
    %78 = vector.broadcast %63 : f32 to vector<2x16x16xf32>
    %79 = arith.addf %77, %78 : vector<2x16x16xf32>
    %cst_59 = arith.constant 0.000000e+00 : f32
    %cst_60 = arith.constant 1.000000e+00 : f32
    %80 = vector.broadcast %cst_59 : f32 to vector<2x16x16xf32>
    %81 = arith.maximumf %80, %79 : vector<2x16x16xf32>
    %82 = vector.broadcast %cst_60 : f32 to vector<2x16x16xf32>
    %83 = arith.minimumf %82, %81 : vector<2x16x16xf32>
    %c0_61 = arith.constant 0 : index
    %c2_62 = arith.constant 2 : index
    %c1_63 = arith.constant 1 : index
    %c1_64 = arith.constant 1 : index
    %84 = vector.load %arg4[%c0_61, %c2_62, %c1_63, %c1_64] : memref<2x8x18x18xf32, #tpu.memory_space<vmem>>, vector<2x1x16x16xf32>
    %85 = vector.shape_cast %84 : vector<2x1x16x16xf32> to vector<2x16x16xf32>
    %86 = vector.shape_cast %83 : vector<2x16x16xf32> to vector<2x1x16x16xf32>
    tpu.vector_store %arg4[%c0_61, %c2_62, %c1_63, %c1_64], %86 {strides = array<i32>} : memref<2x8x18x18xf32, #tpu.memory_space<vmem>>, vector<2x1x16x16xf32>,
    %c3 = arith.constant 3 : index
    %c0_65 = arith.constant 0 : index
    %87 = memref.load %arg1[%c3, %c0_65] : memref<8x3xf32, #tpu.memory_space<smem>>
    %c3_66 = arith.constant 3 : index
    %c1_67 = arith.constant 1 : index
    %88 = memref.load %arg1[%c3_66, %c1_67] : memref<8x3xf32, #tpu.memory_space<smem>>
    %c3_68 = arith.constant 3 : index
    %c2_69 = arith.constant 2 : index
    %89 = memref.load %arg1[%c3_68, %c2_69] : memref<8x3xf32, #tpu.memory_space<smem>>
    %c3_70 = arith.constant 3 : index
    %90 = memref.load %arg2[%c3_70] : memref<8xf32, #tpu.memory_space<smem>>
    %cst_71 = arith.constant 0.000000e+00 : f32
    %cst_72 = arith.constant 1.000000e+00 : f32
    %91 = arith.maximumf %cst_71, %90 : f32
    %92 = arith.minimumf %cst_72, %91 : f32
    %93 = vector.broadcast %92 : f32 to vector<2x18x18xf32>
    %c0_73 = arith.constant 0 : index
    %c3_74 = arith.constant 3 : index
    %c0_75 = arith.constant 0 : index
    %c0_76 = arith.constant 0 : index
    %94 = vector.load %arg4[%c0_73, %c3_74, %c0_75, %c0_76] : memref<2x8x18x18xf32, #tpu.memory_space<vmem>>, vector<2x1x18x18xf32>
    %95 = vector.shape_cast %94 : vector<2x1x18x18xf32> to vector<2x18x18xf32>
    %96 = vector.shape_cast %93 : vector<2x18x18xf32> to vector<2x1x18x18xf32>
    tpu.vector_store %arg4[%c0_73, %c3_74, %c0_75, %c0_76], %96 {strides = array<i32>} : memref<2x8x18x18xf32, #tpu.memory_space<vmem>>, vector<2x1x18x18xf32>,
    %97 = vector.broadcast %87 : f32 to vector<2x16x16xf32>
    %98 = arith.mulf %1, %97 : vector<2x16x16xf32>
    %99 = vector.broadcast %88 : f32 to vector<2x16x16xf32>
    %100 = arith.mulf %3, %99 : vector<2x16x16xf32>
    %101 = arith.addf %98, %100 : vector<2x16x16xf32>
    %102 = vector.broadcast %89 : f32 to vector<2x16x16xf32>
    %103 = arith.mulf %5, %102 : vector<2x16x16xf32>
    %104 = arith.addf %101, %103 : vector<2x16x16xf32>
    %105 = vector.broadcast %90 : f32 to vector<2x16x16xf32>
    %106 = arith.addf %104, %105 : vector<2x16x16xf32>
    %cst_77 = arith.constant 0.000000e+00 : f32
    %cst_78 = arith.constant 1.000000e+00 : f32
    %107 = vector.broadcast %cst_77 : f32 to vector<2x16x16xf32>
    %108 = arith.maximumf %107, %106 : vector<2x16x16xf32>
    %109 = vector.broadcast %cst_78 : f32 to vector<2x16x16xf32>
    %110 = arith.minimumf %109, %108 : vector<2x16x16xf32>
    %c0_79 = arith.constant 0 : index
    %c3_80 = arith.constant 3 : index
    %c1_81 = arith.constant 1 : index
    %c1_82 = arith.constant 1 : index
    %111 = vector.load %arg4[%c0_79, %c3_80, %c1_81, %c1_82] : memref<2x8x18x18xf32, #tpu.memory_space<vmem>>, vector<2x1x16x16xf32>
    %112 = vector.shape_cast %111 : vector<2x1x16x16xf32> to vector<2x16x16xf32>
    %113 = vector.shape_cast %110 : vector<2x16x16xf32> to vector<2x1x16x16xf32>
    tpu.vector_store %arg4[%c0_79, %c3_80, %c1_81, %c1_82], %113 {strides = array<i32>} : memref<2x8x18x18xf32, #tpu.memory_space<vmem>>, vector<2x1x16x16xf32>,
    %c4 = arith.constant 4 : index
    %c0_83 = arith.constant 0 : index
    %114 = memref.load %arg1[%c4, %c0_83] : memref<8x3xf32, #tpu.memory_space<smem>>
    %c4_84 = arith.constant 4 : index
    %c1_85 = arith.constant 1 : index
    %115 = memref.load %arg1[%c4_84, %c1_85] : memref<8x3xf32, #tpu.memory_space<smem>>
    %c4_86 = arith.constant 4 : index
    %c2_87 = arith.constant 2 : index
    %116 = memref.load %arg1[%c4_86, %c2_87] : memref<8x3xf32, #tpu.memory_space<smem>>
    %c4_88 = arith.constant 4 : index
    %117 = memref.load %arg2[%c4_88] : memref<8xf32, #tpu.memory_space<smem>>
    %cst_89 = arith.constant 0.000000e+00 : f32
    %cst_90 = arith.constant 1.000000e+00 : f32
    %118 = arith.maximumf %cst_89, %117 : f32
    %119 = arith.minimumf %cst_90, %118 : f32
    %120 = vector.broadcast %119 : f32 to vector<2x18x18xf32>
    %c0_91 = arith.constant 0 : index
    %c4_92 = arith.constant 4 : index
    %c0_93 = arith.constant 0 : index
    %c0_94 = arith.constant 0 : index
    %121 = vector.load %arg4[%c0_91, %c4_92, %c0_93, %c0_94] : memref<2x8x18x18xf32, #tpu.memory_space<vmem>>, vector<2x1x18x18xf32>
    %122 = vector.shape_cast %121 : vector<2x1x18x18xf32> to vector<2x18x18xf32>
    %123 = vector.shape_cast %120 : vector<2x18x18xf32> to vector<2x1x18x18xf32>
    tpu.vector_store %arg4[%c0_91, %c4_92, %c0_93, %c0_94], %123 {strides = array<i32>} : memref<2x8x18x18xf32, #tpu.memory_space<vmem>>, vector<2x1x18x18xf32>,
    %124 = vector.broadcast %114 : f32 to vector<2x16x16xf32>
    %125 = arith.mulf %1, %124 : vector<2x16x16xf32>
    %126 = vector.broadcast %115 : f32 to vector<2x16x16xf32>
    %127 = arith.mulf %3, %126 : vector<2x16x16xf32>
    %128 = arith.addf %125, %127 : vector<2x16x16xf32>
    %129 = vector.broadcast %116 : f32 to vector<2x16x16xf32>
    %130 = arith.mulf %5, %129 : vector<2x16x16xf32>
    %131 = arith.addf %128, %130 : vector<2x16x16xf32>
    %132 = vector.broadcast %117 : f32 to vector<2x16x16xf32>
    %133 = arith.addf %131, %132 : vector<2x16x16xf32>
    %cst_95 = arith.constant 0.000000e+00 : f32
    %cst_96 = arith.constant 1.000000e+00 : f32
    %134 = vector.broadcast %cst_95 : f32 to vector<2x16x16xf32>
    %135 = arith.maximumf %134, %133 : vector<2x16x16xf32>
    %136 = vector.broadcast %cst_96 : f32 to vector<2x16x16xf32>
    %137 = arith.minimumf %136, %135 : vector<2x16x16xf32>
    %c0_97 = arith.constant 0 : index
    %c4_98 = arith.constant 4 : index
    %c1_99 = arith.constant 1 : index
    %c1_100 = arith.constant 1 : index
    %138 = vector.load %arg4[%c0_97, %c4_98, %c1_99, %c1_100] : memref<2x8x18x18xf32, #tpu.memory_space<vmem>>, vector<2x1x16x16xf32>
    %139 = vector.shape_cast %138 : vector<2x1x16x16xf32> to vector<2x16x16xf32>
    %140 = vector.shape_cast %137 : vector<2x16x16xf32> to vector<2x1x16x16xf32>
    tpu.vector_store %arg4[%c0_97, %c4_98, %c1_99, %c1_100], %140 {strides = array<i32>} : memref<2x8x18x18xf32, #tpu.memory_space<vmem>>, vector<2x1x16x16xf32>,
    %c5 = arith.constant 5 : index
    %c0_101 = arith.constant 0 : index
    %141 = memref.load %arg1[%c5, %c0_101] : memref<8x3xf32, #tpu.memory_space<smem>>
    %c5_102 = arith.constant 5 : index
    %c1_103 = arith.constant 1 : index
    %142 = memref.load %arg1[%c5_102, %c1_103] : memref<8x3xf32, #tpu.memory_space<smem>>
    %c5_104 = arith.constant 5 : index
    %c2_105 = arith.constant 2 : index
    %143 = memref.load %arg1[%c5_104, %c2_105] : memref<8x3xf32, #tpu.memory_space<smem>>
    %c5_106 = arith.constant 5 : index
    %144 = memref.load %arg2[%c5_106] : memref<8xf32, #tpu.memory_space<smem>>
    %cst_107 = arith.constant 0.000000e+00 : f32
    %cst_108 = arith.constant 1.000000e+00 : f32
    %145 = arith.maximumf %cst_107, %144 : f32
    %146 = arith.minimumf %cst_108, %145 : f32
    %147 = vector.broadcast %146 : f32 to vector<2x18x18xf32>
    %c0_109 = arith.constant 0 : index
    %c5_110 = arith.constant 5 : index
    %c0_111 = arith.constant 0 : index
    %c0_112 = arith.constant 0 : index
    %148 = vector.load %arg4[%c0_109, %c5_110, %c0_111, %c0_112] : memref<2x8x18x18xf32, #tpu.memory_space<vmem>>, vector<2x1x18x18xf32>
    %149 = vector.shape_cast %148 : vector<2x1x18x18xf32> to vector<2x18x18xf32>
    %150 = vector.shape_cast %147 : vector<2x18x18xf32> to vector<2x1x18x18xf32>
    tpu.vector_store %arg4[%c0_109, %c5_110, %c0_111, %c0_112], %150 {strides = array<i32>} : memref<2x8x18x18xf32, #tpu.memory_space<vmem>>, vector<2x1x18x18xf32>,
    %151 = vector.broadcast %141 : f32 to vector<2x16x16xf32>
    %152 = arith.mulf %1, %151 : vector<2x16x16xf32>
    %153 = vector.broadcast %142 : f32 to vector<2x16x16xf32>
    %154 = arith.mulf %3, %153 : vector<2x16x16xf32>
    %155 = arith.addf %152, %154 : vector<2x16x16xf32>
    %156 = vector.broadcast %143 : f32 to vector<2x16x16xf32>
    %157 = arith.mulf %5, %156 : vector<2x16x16xf32>
    %158 = arith.addf %155, %157 : vector<2x16x16xf32>
    %159 = vector.broadcast %144 : f32 to vector<2x16x16xf32>
    %160 = arith.addf %158, %159 : vector<2x16x16xf32>
    %cst_113 = arith.constant 0.000000e+00 : f32
    %cst_114 = arith.constant 1.000000e+00 : f32
    %161 = vector.broadcast %cst_113 : f32 to vector<2x16x16xf32>
    %162 = arith.maximumf %161, %160 : vector<2x16x16xf32>
    %163 = vector.broadcast %cst_114 : f32 to vector<2x16x16xf32>
    %164 = arith.minimumf %163, %162 : vector<2x16x16xf32>
    %c0_115 = arith.constant 0 : index
    %c5_116 = arith.constant 5 : index
    %c1_117 = arith.constant 1 : index
    %c1_118 = arith.constant 1 : index
    %165 = vector.load %arg4[%c0_115, %c5_116, %c1_117, %c1_118] : memref<2x8x18x18xf32, #tpu.memory_space<vmem>>, vector<2x1x16x16xf32>
    %166 = vector.shape_cast %165 : vector<2x1x16x16xf32> to vector<2x16x16xf32>
    %167 = vector.shape_cast %164 : vector<2x16x16xf32> to vector<2x1x16x16xf32>
    tpu.vector_store %arg4[%c0_115, %c5_116, %c1_117, %c1_118], %167 {strides = array<i32>} : memref<2x8x18x18xf32, #tpu.memory_space<vmem>>, vector<2x1x16x16xf32>,
    %c6 = arith.constant 6 : index
    %c0_119 = arith.constant 0 : index
    %168 = memref.load %arg1[%c6, %c0_119] : memref<8x3xf32, #tpu.memory_space<smem>>
    %c6_120 = arith.constant 6 : index
    %c1_121 = arith.constant 1 : index
    %169 = memref.load %arg1[%c6_120, %c1_121] : memref<8x3xf32, #tpu.memory_space<smem>>
    %c6_122 = arith.constant 6 : index
    %c2_123 = arith.constant 2 : index
    %170 = memref.load %arg1[%c6_122, %c2_123] : memref<8x3xf32, #tpu.memory_space<smem>>
    %c6_124 = arith.constant 6 : index
    %171 = memref.load %arg2[%c6_124] : memref<8xf32, #tpu.memory_space<smem>>
    %cst_125 = arith.constant 0.000000e+00 : f32
    %cst_126 = arith.constant 1.000000e+00 : f32
    %172 = arith.maximumf %cst_125, %171 : f32
    %173 = arith.minimumf %cst_126, %172 : f32
    %174 = vector.broadcast %173 : f32 to vector<2x18x18xf32>
    %c0_127 = arith.constant 0 : index
    %c6_128 = arith.constant 6 : index
    %c0_129 = arith.constant 0 : index
    %c0_130 = arith.constant 0 : index
    %175 = vector.load %arg4[%c0_127, %c6_128, %c0_129, %c0_130] : memref<2x8x18x18xf32, #tpu.memory_space<vmem>>, vector<2x1x18x18xf32>
    %176 = vector.shape_cast %175 : vector<2x1x18x18xf32> to vector<2x18x18xf32>
    %177 = vector.shape_cast %174 : vector<2x18x18xf32> to vector<2x1x18x18xf32>
    tpu.vector_store %arg4[%c0_127, %c6_128, %c0_129, %c0_130], %177 {strides = array<i32>} : memref<2x8x18x18xf32, #tpu.memory_space<vmem>>, vector<2x1x18x18xf32>,
    %178 = vector.broadcast %168 : f32 to vector<2x16x16xf32>
    %179 = arith.mulf %1, %178 : vector<2x16x16xf32>
    %180 = vector.broadcast %169 : f32 to vector<2x16x16xf32>
    %181 = arith.mulf %3, %180 : vector<2x16x16xf32>
    %182 = arith.addf %179, %181 : vector<2x16x16xf32>
    %183 = vector.broadcast %170 : f32 to vector<2x16x16xf32>
    %184 = arith.mulf %5, %183 : vector<2x16x16xf32>
    %185 = arith.addf %182, %184 : vector<2x16x16xf32>
    %186 = vector.broadcast %171 : f32 to vector<2x16x16xf32>
    %187 = arith.addf %185, %186 : vector<2x16x16xf32>
    %cst_131 = arith.constant 0.000000e+00 : f32
    %cst_132 = arith.constant 1.000000e+00 : f32
    %188 = vector.broadcast %cst_131 : f32 to vector<2x16x16xf32>
    %189 = arith.maximumf %188, %187 : vector<2x16x16xf32>
    %190 = vector.broadcast %cst_132 : f32 to vector<2x16x16xf32>
    %191 = arith.minimumf %190, %189 : vector<2x16x16xf32>
    %c0_133 = arith.constant 0 : index
    %c6_134 = arith.constant 6 : index
    %c1_135 = arith.constant 1 : index
    %c1_136 = arith.constant 1 : index
    %192 = vector.load %arg4[%c0_133, %c6_134, %c1_135, %c1_136] : memref<2x8x18x18xf32, #tpu.memory_space<vmem>>, vector<2x1x16x16xf32>
    %193 = vector.shape_cast %192 : vector<2x1x16x16xf32> to vector<2x16x16xf32>
    %194 = vector.shape_cast %191 : vector<2x16x16xf32> to vector<2x1x16x16xf32>
    tpu.vector_store %arg4[%c0_133, %c6_134, %c1_135, %c1_136], %194 {strides = array<i32>} : memref<2x8x18x18xf32, #tpu.memory_space<vmem>>, vector<2x1x16x16xf32>,
    %c7 = arith.constant 7 : index
    %c0_137 = arith.constant 0 : index
    %195 = memref.load %arg1[%c7, %c0_137] : memref<8x3xf32, #tpu.memory_space<smem>>
    %c7_138 = arith.constant 7 : index
    %c1_139 = arith.constant 1 : index
    %196 = memref.load %arg1[%c7_138, %c1_139] : memref<8x3xf32, #tpu.memory_space<smem>>
    %c7_140 = arith.constant 7 : index
    %c2_141 = arith.constant 2 : index
    %197 = memref.load %arg1[%c7_140, %c2_141] : memref<8x3xf32, #tpu.memory_space<smem>>
    %c7_142 = arith.constant 7 : index
    %198 = memref.load %arg2[%c7_142] : memref<8xf32, #tpu.memory_space<smem>>
    %cst_143 = arith.constant 0.000000e+00 : f32
    %cst_144 = arith.constant 1.000000e+00 : f32
    %199 = arith.maximumf %cst_143, %198 : f32
    %200 = arith.minimumf %cst_144, %199 : f32
    %201 = vector.broadcast %200 : f32 to vector<2x18x18xf32>
    %c0_145 = arith.constant 0 : index
    %c7_146 = arith.constant 7 : index
    %c0_147 = arith.constant 0 : index
    %c0_148 = arith.constant 0 : index
    %202 = vector.load %arg4[%c0_145, %c7_146, %c0_147, %c0_148] : memref<2x8x18x18xf32, #tpu.memory_space<vmem>>, vector<2x1x18x18xf32>
    %203 = vector.shape_cast %202 : vector<2x1x18x18xf32> to vector<2x18x18xf32>
    %204 = vector.shape_cast %201 : vector<2x18x18xf32> to vector<2x1x18x18xf32>
    tpu.vector_store %arg4[%c0_145, %c7_146, %c0_147, %c0_148], %204 {strides = array<i32>} : memref<2x8x18x18xf32, #tpu.memory_space<vmem>>, vector<2x1x18x18xf32>,
    %205 = vector.broadcast %195 : f32 to vector<2x16x16xf32>
    %206 = arith.mulf %1, %205 : vector<2x16x16xf32>
    %207 = vector.broadcast %196 : f32 to vector<2x16x16xf32>
    %208 = arith.mulf %3, %207 : vector<2x16x16xf32>
    %209 = arith.addf %206, %208 : vector<2x16x16xf32>
    %210 = vector.broadcast %197 : f32 to vector<2x16x16xf32>
    %211 = arith.mulf %5, %210 : vector<2x16x16xf32>
    %212 = arith.addf %209, %211 : vector<2x16x16xf32>
    %213 = vector.broadcast %198 : f32 to vector<2x16x16xf32>
    %214 = arith.addf %212, %213 : vector<2x16x16xf32>
    %cst_149 = arith.constant 0.000000e+00 : f32
    %cst_150 = arith.constant 1.000000e+00 : f32
    %215 = vector.broadcast %cst_149 : f32 to vector<2x16x16xf32>
    %216 = arith.maximumf %215, %214 : vector<2x16x16xf32>
    %217 = vector.broadcast %cst_150 : f32 to vector<2x16x16xf32>
    %218 = arith.minimumf %217, %216 : vector<2x16x16xf32>
    %c0_151 = arith.constant 0 : index
    %c7_152 = arith.constant 7 : index
    %c1_153 = arith.constant 1 : index
    %c1_154 = arith.constant 1 : index
    %219 = vector.load %arg4[%c0_151, %c7_152, %c1_153, %c1_154] : memref<2x8x18x18xf32, #tpu.memory_space<vmem>>, vector<2x1x16x16xf32>
    %220 = vector.shape_cast %219 : vector<2x1x16x16xf32> to vector<2x16x16xf32>
    %221 = vector.shape_cast %218 : vector<2x16x16xf32> to vector<2x1x16x16xf32>
    tpu.vector_store %arg4[%c0_151, %c7_152, %c1_153, %c1_154], %221 {strides = array<i32>} : memref<2x8x18x18xf32, #tpu.memory_space<vmem>>, vector<2x1x16x16xf32>,
    return
  }
  func.func @transform_0(%arg0: i32) -> (i32, i32) {
    %c0_i32 = arith.constant 0 : i32
    %c0_i32_0 = arith.constant 0 : i32
    %c0_i32_1 = arith.constant 0 : i32
    return %c0_i32, %c0_i32_0 : i32, i32
  }
  func.func @transform_1(%arg0: i32) -> i32 {
    %c0_i32 = arith.constant 0 : i32
    %c0_i32_0 = arith.constant 0 : i32
    return %c0_i32 : i32
  }
  func.func @transform_2(%arg0: i32) -> (i32, i32, i32, i32) {
    %c0_i32 = arith.constant 0 : i32
    %c0_i32_0 = arith.constant 0 : i32
    %c0_i32_1 = arith.constant 0 : i32
    %c0_i32_2 = arith.constant 0 : i32
    return %arg0, %c0_i32, %c0_i32_0, %c0_i32_1 : i32, i32, i32, i32
  }
  func.func @transform_3(%arg0: i32) -> (i32, i32, i32, i32) {
    %c0_i32 = arith.constant 0 : i32
    %c0_i32_0 = arith.constant 0 : i32
    %c0_i32_1 = arith.constant 0 : i32
    %c0_i32_2 = arith.constant 0 : i32
    return %arg0, %c0_i32, %c0_i32_0, %c0_i32_1 : i32, i32, i32, i32
  }
}

</mosaic_0001>

<bundles_post_ra>
// kernel: tpu_custom_call.1
= control target key start
LH: loop header
LB: loop body
LE: loop exit
PB: predicated region body
PF: predicated region fallthrough
CT: control target
= control target key end

     0   :  { %8 = vsyncpa [#allocation4], 0  ;;  %s1597_s0 = inlined_call_operand.vmem [shape: f32[8,3], index: 0, kind: input, shape index: {}]   ;;  %s1598_s1 = inlined_call_operand.vmem [shape: f32[8], index: 1, kind: input, shape index: {}]   ;;  %s1599_s2 = inlined_call_operand.hbm [shape: f32[2,3,16,16], index: 2, kind: input, shape index: {}]   ;;  %s1600_s3 = inlined_call_operand.vmem [shape: f32[2,8,18,18], index: 3, kind: output, shape index: {}]  }
   0x1   :  { %9 = vsyncpa [#allocation6], 0  ;;  %s16_s14 = sshll.u32 %s1597_s0, 4  ;;  %s17_s14 = int_to_ptr.vmem [resolvable:$true] %s16_s14 }
   0x2   :  { %10 = vsyncpa [#allocation3], 0  ;;  %s25_s17 = sshll.u32 %s1598_s1, 4  ;;  %s800_s18 = smov [#allocation2]   ;;  %s26_s17 = int_to_ptr.vmem [resolvable:$true] %s25_s17 }
   0x3   :  { %19 = dma.vmem_to_smem %s17_s14, 128, %s800_s18, [#allocation4]  }
   0x4   :  { %s801_s19 = smov [#allocation5]   ;;  %s33_s22 = sshll.u32 %s1599_s2, 4  ;;  %s34_s22 = int_to_ptr.hbm [resolvable:$true] %s33_s22 }
   0x5   :  { %28 = dma.vmem_to_smem %s26_s17, 16, %s801_s19, [#allocation6]  }
   0x6   :  { %s802_s23 = smov [#allocation7]   ;;  %s803_s0 = smov 128  }
   0x7   :  { %s35_s24 = sshll.u32 %s802_s23, 4  ;;  %s804_s25 = smov 8   ;;  %s36_s24 = int_to_ptr.vmem [resolvable:$true] %s35_s24 }
   0x8   :  { %41 = dma.hbm_to_vmem [thread:$0]  %s34_s22, 1536, %s36_s24, [#allocation3], %s803_s0, %s803_s0, %s804_s25  }
   0x9   :  { %794 = dma.done.wait [#allocation4], 128  }
   0xa   :  { %795 = vsyncadd [#allocation4], 4294967168 }
   0xb   :  { %796 = dma.done.wait [#allocation6], 16  }
   0xc   :  { %797 = vsyncadd [#allocation6], 4294967280 }
   0xd   :  { %798 = dma.done.wait [#allocation3], 1536  }
   0xe   :  { %799 = vsyncadd [#allocation3], 4294965760 }
   0xf   :  { %54 = sfence }
  0x10   :  { %s69_s1 = sld [smem:[#allocation2]]  ;;  %v839_v0 = vld [vmem:[#allocation7 + $0x30] sm:$0xff]  ;;  %v841_v1 = vld [vmem:[#allocation7] sm:$0xff]  ;;  %v843_v2 = vld [vmem:[#allocation7 + $0x38] sm:$0xff]  ;;  %s805_s12 = smov 1   ;;  %vm76_vm0 = vcmask 146432  }
  0x11   :  { %s638_s26 = sld [smem:[#allocation2 + $0x1]]  ;;  %v847_v3 = vld [vmem:[#allocation7 + $0x40] sm:$0xff]  ;;  %v849_v4 = vld [vmem:[#allocation7 + $0x10] sm:$0xff]  ;;  %v851_v5 = vld [vmem:[#allocation7 + $0x48] sm:$0xff]  ;;  %vm79_vm1 = vcmask 140288   ;;  %vm136_vm2 = vcmask 138248  }
  0x12   :  { %s639_s27 = sld [smem:[#allocation2 + $0x2]]  ;;  %v855_v6 = vld [vmem:[#allocation7 + $0x50] sm:$0xff]  ;;  %v857_v8 = vld [vmem:[#allocation7 + $0x20] sm:$0xff]  ;;  %v859_v9 = vld [vmem:[#allocation7 + $0x58] sm:$0xff] }
  0x13   :  { %s837_s28 = sld [smem:[#allocation5]]  ;;  %v866_v14 = vld [vmem:[#allocation7 + $0x8] sm:$0xff]  ;;  %v871_v19 = vld [vmem:[#allocation7 + $0x18] sm:$0xff] }
  0x14   :  { %s845_s2 = sld [smem:[#allocation2 + $0x80]]  ;;  %v873_v20 = vld [vmem:[#allocation7 + $0x28] sm:$0xff] }
  0x15   :  { %s853_s29 = sld [smem:[#allocation2 + $0x81]] }
  0x16   :  { %v84_v7 = vstv %s69_s1  ;;  %s861_s30 = sld [smem:[#allocation2 + $0x82]] }
  0x17   :  { %v87_v10 = vmul.f32 %v84_v7, %v839_v0  ;;  %v89_v11 = vstv %s638_s26  ;;  %v85_v12 = vmul.f32 %v84_v7, %v841_v1  ;;  %v88_v13 = vmul.f32 %v84_v7, %v843_v2  ;;  %s879_s4 = sld [smem:[#allocation2 + $0x100]]  ;;  %s806_s26 = smov 0.0  }
  0x18   :  { %v92_v15 = vmul.f32 %v89_v11, %v847_v3  ;;  %v98_v16 = vstv %s639_s27  ;;  %v90_v17 = vmul.f32 %v89_v11, %v849_v4  ;;  %v93_v18 = vmul.f32 %v89_v11, %v851_v5  ;;  %s882_s5 = sld [smem:[#allocation5 + $0x1]] }
  0x19   :  { %v101_v21 = vmul.f32 %v98_v16, %v855_v6  ;;  %v107_v22 = vstv %s837_s28  ;;  %v99_v23 = vmul.f32 %v98_v16, %v857_v8  ;;  %v102_v24 = vmul.f32 %v98_v16, %v859_v9  ;;  %s892_s6 = sld [smem:[#allocation2 + $0x101]] }
  0x1a   :  { %v96_v25 = vadd.f32 %v92_v15, %v87_v10  ;;  %v94_v26 = vadd.f32 %v90_v17, %v85_v12  ;;  %v97_v27 = vadd.f32 %v93_v18, %v88_v13  ;;  %v86_v28 = vmul.f32 %v84_v7, %v866_v14  ;;  %s896_s7 = sld [smem:[#allocation2 + $0x102]] }
  0x1b   :  { %v91_v29 = vmul.f32 %v89_v11, %v871_v19  ;;  %v100_v30 = vmul.f32 %v98_v16, %v873_v20  ;;  %v887_v31 = vstv %s845_s2  ;;  %v890_v32 = vstv %s853_s29  ;;  %s905_s8 = sld [smem:[#allocation2 + $0x180]]  ;;  %s807_s2 = smov 1.0  }
  0x1c   :  { %v105_v33 = vadd.f32 %v101_v21, %v96_v25  ;;  %v103_v34 = vadd.f32 %v99_v23, %v94_v26  ;;  %v106_v35 = vadd.f32 %v102_v24, %v97_v27  ;;  %v159_v36 = vmul.f32 %v887_v31, %v843_v2  ;;  %s911_s9 = sld [smem:[#allocation2 + $0x181]] }
  0x1d   :  { %v95_v37 = vadd.f32 %v91_v29, %v86_v28  ;;  %v164_v38 = vmul.f32 %v890_v32, %v851_v5  ;;  %v901_v39 = vstv %s861_s30  ;;  %v158_v46 = vmul.f32 %v887_v31, %v839_v0  ;;  %s915_s10 = sld [smem:[#allocation2 + $0x182]] }
  0x1e   :  { %v110_v40 = vadd.f32 %v107_v22, %v105_v33  ;;  %v108_v41 = vadd.f32 %v107_v22, %v103_v34  ;;  %v111_v42 = vadd.f32 %v107_v22, %v106_v35  ;;  %v173_v43 = vmul.f32 %v901_v39, %v859_v9  ;;  %s917_s11 = sld [smem:[#allocation5 + $0x2]] }
  0x1f   :  { %v104_v44 = vadd.f32 %v100_v30, %v95_v37  ;;  %v168_v45 = vadd.f32 %v164_v38, %v159_v36  ;;  %v163_v47 = vmul.f32 %v890_v32, %v847_v3  ;;  %v172_v50 = vmul.f32 %v901_v39, %v855_v6  ;;  %s939_s13 = sld [smem:[#allocation2 + $0x200]] }
  0x20   :  { %v114_v48 = vmax.f32 %v110_v40, 0.0  ;;  %v112_v49 = vmax.f32 %v108_v41, 0.0  ;;  %v920_v54 = vstv %s879_s4  ;;  %v923_v57 = vstv %s882_s5  ;;  %s945_s14 = sld [smem:[#allocation2 + $0x201]] }
  0x21   :  { %v109_v51 = vadd.f32 %v107_v22, %v104_v44  ;;  %v177_v52 = vadd.f32 %v173_v43, %v168_v45  ;;  %v167_v53 = vadd.f32 %v163_v47, %v158_v46  ;;  %v228_v58 = vmul.f32 %v920_v54, %v839_v0  ;;  %s954_s15 = sld [smem:[#allocation2 + $0x202]] }
  0x22   :  { %v118_v55 = vmin.f32 %v114_v48, 1.0  ;;  %v116_v56 = vmin.f32 %v112_v49, 1.0  ;;  %v115_v59 = vmax.f32 %v111_v42, 0.0  ;;  %v928_v62 = vstv %s892_s6  ;;  %s961_s16 = sld [smem:[#allocation5 + $0x3]] }
  0x23   :  { %v113_v60 = vmax.f32 %v109_v51, 0.0  ;;  %v176_v61 = vadd.f32 %v172_v50, %v167_v53  ;;  %v233_v63 = vmul.f32 %v928_v62, %v847_v3  ;;  %v935_v7 = vstv %s896_s7  ;;  %s983_s17 = sld [smem:[#allocation5 + $0x4]] }
  0x24   :  { %128 = vrot.lane.b32.xlu1 %v118_v55, %s805_s12  ;;  %124 = vrot.lane.b32.xlu0 %v116_v56, %s805_s12  ;;  %v227_v10 = vmul.f32 %v920_v54, %v866_v14  ;;  %v182_v11 = vadd.f32 %v923_v57, %v177_v52  ;;  %v242_v13 = vmul.f32 %v935_v7, %v855_v6  ;;  %v952_v18 = vstv %s905_s8  ;;  %s1018_s18 = sld [smem:[#allocation2 + $0x280]]  ;;  %s73_s8 = smax.f32 %s806_s26, %s837_s28 }
  0x25   :  { %v181_v12 = vadd.f32 %v923_v57, %v176_v61  ;;  %v237_v15 = vadd.f32 %v233_v63, %v228_v58  ;;  %v232_v16 = vmul.f32 %v928_v62, %v871_v19  ;;  %v241_v17 = vmul.f32 %v935_v7, %v873_v20  ;;  %s1026_s19 = sld [smem:[#allocation2 + $0x281]]  ;;  %s74_s28 = smin.f32 %s807_s2, %s73_s8 }
  0x26   :  { %v119_v21 = vmin.f32 %v115_v59, 1.0  ;;  %v117_v22 = vmin.f32 %v113_v60, 1.0  ;;  %v297_v23 = vmul.f32 %v952_v18, %v866_v14  ;;  %v959_v24 = vstv %s911_s9  ;;  %s1037_s20 = sld [smem:[#allocation2 + $0x282]] }
  0x27   :  { %v246_v25 = vadd.f32 %v242_v13, %v237_v15  ;;  %v236_v26 = vadd.f32 %v232_v16, %v227_v10  ;;  %v302_v27 = vmul.f32 %v959_v24, %v871_v19  ;;  %v966_v28 = vstv %s915_s10  ;;  %s1054_s21 = sld [smem:[#allocation5 + $0x5]] }
  0x28   :  { %v186_v29 = vmax.f32 %v182_v11, 0.0  ;;  %v969_v30 = vstv %s917_s11  ;;  %v156_v33 = vmul.f32 %v887_v31, %v841_v1  ;;  %v185_v34 = vmax.f32 %v181_v12, 0.0  ;;  %s1059_s22 = sld [smem:[#allocation2 + $0x300]] }
  0x29   :  { %v245_v35 = vadd.f32 %v241_v17, %v236_v26  ;;  %v311_v36 = vmul.f32 %v966_v28, %v873_v20  ;;  %v161_v37 = vmul.f32 %v890_v32, %v849_v4  ;;  %v306_v38 = vadd.f32 %v302_v27, %v297_v23  ;;  %s1066_s23 = sld [smem:[#allocation2 + $0x301]] }
  0x2a   :  { %v170_v40 = vmul.f32 %v901_v39, %v857_v8  ;;  %v296_v41 = vmul.f32 %v952_v18, %v841_v1  ;;  %v301_v42 = vmul.f32 %v959_v24, %v849_v4  ;;  %v251_v43 = vadd.f32 %v969_v30, %v246_v25  ;;  %s1075_s24 = sld [smem:[#allocation2 + $0x302]] }
  0x2b   :  { %v165_v44 = vadd.f32 %v161_v37, %v156_v33  ;;  %v310_v45 = vmul.f32 %v966_v28, %v857_v8  ;;  %v991_v47 = vstv %s939_s13  ;;  %v994_v48 = vstv %s945_s14  ;;  %s1082_s0 = sld [smem:[#allocation2 + $0x380]] }
  0x2c   :  { %130 = vrot.lane.b32.xlu1 %v119_v21, %s805_s12  ;;  %126 = vrot.lane.b32.xlu0 %v117_v22, %s805_s12  ;;  %v305_v46 = vadd.f32 %v301_v42, %v296_v41  ;;  %v190_v49 = vmin.f32 %v186_v29, 1.0  ;;  %v250_v50 = vadd.f32 %v969_v30, %v245_v35  ;;  %v998_v52 = vstv %s954_s15  ;;  %s1099_s25 = sld [smem:[#allocation2 + $0x381]] }
  0x2d   :  { %v174_v51 = vadd.f32 %v170_v40, %v165_v44  ;;  %v189_v53 = vmin.f32 %v185_v34, 1.0  ;;  %v315_v55 = vadd.f32 %v311_v36, %v306_v38  ;;  %v366_v56 = vmul.f32 %v991_v47, %v841_v1  ;;  %s1105_s1 = sld [smem:[#allocation2 + $0x382]]  ;;  %s425_s27 = smax.f32 %s806_s26, %s1054_s21 }
  0x2e   :  { %v371_v58 = vmul.f32 %v994_v48, %v849_v4  ;;  %v255_v59 = vmax.f32 %v251_v43, 0.0  ;;  %v1005_v60 = vstv %s961_s16  ;;  %v314_v63 = vadd.f32 %v310_v45, %v305_v46  ;;  %s1153_s29 = smin.f32 %s807_s2, %s425_s27  ;;  %s1155_s30 = sld [smem:[#allocation5 + $0x6]] }
  0x2f   :  { %v179_v61 = vadd.f32 %v923_v57, %v174_v51  ;;  %v380_v11 = vmul.f32 %v998_v52, %v857_v8  ;;  %v157_v12 = vmul.f32 %v887_v31, %v866_v14  ;;  %v162_v13 = vmul.f32 %v890_v32, %v871_v19  ;;  %s1201_s7 = sld [smem:[#allocation5 + $0x7]] }
  0x30   :  { %v375_v10 = vadd.f32 %v371_v58, %v366_v56  ;;  %v254_v15 = vmax.f32 %v250_v50, 0.0  ;;  %v171_v17 = vmul.f32 %v901_v39, %v873_v20  ;;  %v299_v21 = vmul.f32 %v952_v18, %v843_v2 }
  0x31   :  { %v183_v16 = vmax.f32 %v179_v61, 0.0  ;;  %v320_v22 = vadd.f32 %v1005_v60, %v315_v55  ;;  %v1022_v23 = vstv %s983_s17  ;;  %v166_v25 = vadd.f32 %v162_v13, %v157_v12 }
  0x32   :  { %v304_v31 = vmul.f32 %v959_v24, %v851_v5  ;;  %v319_v39 = vadd.f32 %v1005_v60, %v314_v63  ;;  %v369_v26 = vmul.f32 %v991_v47, %v843_v2  ;;  %v374_v27 = vmul.f32 %v994_v48, %v851_v5 }
  0x33   :  { %v187_v32 = vmin.f32 %v183_v16, 1.0  ;;  %v384_v29 = vadd.f32 %v380_v11, %v375_v10  ;;  %v175_v33 = vadd.f32 %v171_v17, %v166_v25  ;;  %v313_v35 = vmul.f32 %v966_v28, %v859_v9 }
  0x34   :  { %201 = vrot.lane.b32.xlu1 %v190_v49, %s805_s12  ;;  %199 = vrot.lane.b32.xlu0 %v189_v53, %s805_s12  ;;  %v308_v34 = vadd.f32 %v304_v31, %v299_v21  ;;  %v378_v36 = vadd.f32 %v374_v27, %v369_v26  ;;  %v383_v37 = vmul.f32 %v998_v52, %v859_v9  ;;  %v259_v41 = vmin.f32 %v255_v59, 1.0  ;;  %s495_s4 = smax.f32 %s806_s26, %s1155_s30 }
  0x35   :  { %195 = vrot.lane.b32.xlu2 %v187_v32, %s805_s12  ;;  %v226_v38 = vmul.f32 %v920_v54, %v841_v1  ;;  %v231_v40 = vmul.f32 %v928_v62, %v849_v4  ;;  %v180_v42 = vadd.f32 %v923_v57, %v175_v33  ;;  %v240_v43 = vmul.f32 %v935_v7, %v857_v8  ;;  %s1199_s6 = smin.f32 %s807_s2, %s495_s4  ;;  %s565_s9 = smax.f32 %s806_s26, %s1201_s7 }
  0x36   :  { %v258_v44 = vmin.f32 %v254_v15, 1.0  ;;  %v368_v46 = vmul.f32 %v991_v47, %v839_v0  ;;  %v373_v49 = vmul.f32 %v994_v48, %v847_v3  ;;  %v324_v50 = vmax.f32 %v320_v22, 0.0  ;;  %s1238_s10 = smin.f32 %s807_s2, %s565_s9 }
  0x37   :  { %v235_v45 = vadd.f32 %v231_v40, %v226_v38  ;;  %v323_v51 = vmax.f32 %v319_v39, 0.0  ;;  %v389_v53 = vadd.f32 %v1022_v23, %v384_v29  ;;  %v184_v55 = vmax.f32 %v180_v42, 0.0 }
  0x38   :  { %v317_v57 = vadd.f32 %v313_v35, %v308_v34  ;;  %v387_v56 = vadd.f32 %v383_v37, %v378_v36  ;;  %v1057_v59 = vstv %s1018_s18  ;;  %v377_v63 = vadd.f32 %v373_v49, %v368_v46 }
  0x39   :  { %v244_v58 = vadd.f32 %v240_v43, %v235_v45  ;;  %v188_v61 = vmin.f32 %v184_v55, 1.0  ;;  %v382_v10 = vmul.f32 %v998_v52, %v855_v6  ;;  %v1064_v11 = vstv %s1026_s19 }
  0x3a   :  { %v438_v13 = vmul.f32 %v1057_v59, %v839_v0  ;;  %v443_v15 = vmul.f32 %v1064_v11, %v847_v3  ;;  %v393_v16 = vmax.f32 %v389_v53, 0.0  ;;  %v1078_v17 = vstv %s1037_s20 }
  0x3b   :  { %v249_v12 = vadd.f32 %v969_v30, %v244_v58  ;;  %v229_v21 = vmul.f32 %v920_v54, %v843_v2  ;;  %v328_v22 = vmin.f32 %v324_v50, 1.0  ;;  %v322_v25 = vadd.f32 %v1005_v60, %v317_v57 }
  0x3c   :  { %269 = vrot.lane.b32.xlu1 %v259_v41, %s805_s12  ;;  %267 = vrot.lane.b32.xlu0 %v258_v44, %s805_s12  ;;  %v1087_v31 = vadd.f32 %v1022_v23, %v387_v56  ;;  %v327_v39 = vmin.f32 %v323_v51, 1.0  ;;  %v386_v26 = vadd.f32 %v382_v10, %v377_v63  ;;  %v234_v27 = vmul.f32 %v928_v62, %v851_v5 }
  0x3d   :  { %197 = vrot.lane.b32.xlu2 %v188_v61, %s805_s12  ;;  %v253_v32 = vmax.f32 %v249_v12, 0.0  ;;  %v243_v54 = vmul.f32 %v935_v7, %v859_v9  ;;  %v447_v29 = vadd.f32 %v443_v15, %v438_v13  ;;  %v452_v33 = vmul.f32 %v1078_v17, %v855_v6 }
  0x3e   :  { %v437_v34 = vmul.f32 %v1057_v59, %v866_v14  ;;  %v442_v35 = vmul.f32 %v1064_v11, %v871_v19  ;;  %v397_v36 = vmin.f32 %v393_v16, 1.0  ;;  %v238_v37 = vadd.f32 %v234_v27, %v229_v21 }
  0x3f   :  { %v326_v62 = vmax.f32 %v322_v25, 0.0  ;;  %v396_v38 = vmax.f32 %v1087_v31, 0.0  ;;  %v257_v7 = vmin.f32 %v253_v32, 1.0  ;;  %v1103_v40 = vstv %s1054_s21 }
  0x40   :  { %v391_v41 = vadd.f32 %v1022_v23, %v386_v26  ;;  %v247_v42 = vadd.f32 %v243_v54, %v238_v37  ;;  %v1109_v43 = vstv %s1059_s22  ;;  %v1112_v44 = vstv %s1066_s23  ;;  %s145_s23 = smax.f32 %s806_s26, %s882_s5 }
  0x41   :  { %v456_v45 = vadd.f32 %v452_v33, %v447_v29  ;;  %v446_v46 = vadd.f32 %v442_v35, %v437_v34  ;;  %v451_v49 = vmul.f32 %v1078_v17, %v873_v20  ;;  %v1119_v50 = vstv %s1075_s24  ;;  %s146_s27 = smin.f32 %s807_s2, %s145_s23  ;;  %s285_s24 = smax.f32 %s806_s26, %s961_s16 }
  0x42   :  { %v252_v51 = vadd.f32 %v969_v30, %v247_v42  ;;  %v298_v53 = vmul.f32 %v952_v18, %v839_v0  ;;  %v303_v55 = vmul.f32 %v959_v24, %v847_v3  ;;  %v1127_v57 = vstv %s1082_s0  ;;  %s286_s4 = smin.f32 %s807_s2, %s285_s24 }
  0x43   :  { %v507_v56 = vmul.f32 %v1109_v43, %v866_v14  ;;  %v512_v58 = vmul.f32 %v1112_v44, %v871_v19  ;;  %v312_v30 = vmul.f32 %v966_v28, %v855_v6  ;;  %v506_v18 = vmul.f32 %v1109_v43, %v841_v1 }
  0x44   :  { %337 = vrot.lane.b32.xlu1 %v328_v22, %s805_s12  ;;  %335 = vrot.lane.b32.xlu0 %v327_v39, %s805_s12  ;;  %v330_v61 = vmin.f32 %v326_v62, 1.0  ;;  %v256_v24 = vmax.f32 %v252_v51, 0.0  ;;  %v307_v63 = vadd.f32 %v303_v55, %v298_v53  ;;  %v511_v10 = vmul.f32 %v1112_v44, %v849_v4 }
  0x45   :  { %265 = vrot.lane.b32.xlu2 %v257_v7, %s805_s12  ;;  %v395_v12 = vmax.f32 %v391_v41, 0.0  ;;  %v1141_v13 = vadd.f32 %v1103_v40, %v456_v45  ;;  %v520_v15 = vmul.f32 %v1119_v50, %v857_v8  ;;  %v576_v28 = vmul.f32 %v1127_v57, %v841_v1 }
  0x46   :  { %v455_v16 = vadd.f32 %v451_v49, %v446_v46  ;;  %v316_v21 = vadd.f32 %v312_v30, %v307_v63  ;;  %v515_v22 = vadd.f32 %v511_v10, %v506_v18  ;;  %v1150_v25 = vstv %s1099_s25 }
  0x47   :  { %v260_v31 = vmin.f32 %v256_v24, 1.0  ;;  %v516_v32 = vadd.f32 %v512_v58, %v507_v56  ;;  %v581_v39 = vmul.f32 %v1150_v25, %v849_v4  ;;  %v1160_v26 = vstv %s1105_s1 }
  0x48   :  { %v521_v27 = vmul.f32 %v1119_v50, %v873_v20  ;;  %v321_v54 = vadd.f32 %v1005_v60, %v316_v21  ;;  %v524_v29 = vadd.f32 %v520_v15, %v515_v22  ;;  %v590_v33 = vmul.f32 %v1160_v26, %v857_v8 }
  0x49   :  { %v400_v34 = vmin.f32 %v396_v38, 1.0  ;;  %v585_v35 = vadd.f32 %v581_v39, %v576_v28  ;;  %v367_v37 = vmul.f32 %v991_v47, %v866_v14  ;;  %v372_v62 = vmul.f32 %v994_v48, %v871_v19 }
  0x4a   :  { %v460_v7 = vadd.f32 %v1103_v40, %v455_v16  ;;  %v325_v41 = vmax.f32 %v321_v54, 0.0  ;;  %v381_v60 = vmul.f32 %v998_v52, %v873_v20  ;;  %v514_v47 = vmul.f32 %v1112_v44, %v851_v5 }
  0x4b   :  { %v1179_v38 = vadd.f32 %v590_v33, %v585_v35  ;;  %v376_v42 = vadd.f32 %v372_v62, %v367_v37  ;;  %v523_v48 = vmul.f32 %v1119_v50, %v859_v9  ;;  %v399_v45 = vmin.f32 %v395_v12, 1.0 }
  0x4c   :  { %405 = vrot.lane.b32.xlu1 %v397_v36, %s805_s12  ;;  %341 = vrot.lane.b32.xlu0 %v330_v61, %s805_s12  ;;  %v509_v36 = vmul.f32 %v1109_v43, %v843_v2  ;;  %v465_v46 = vmax.f32 %v1141_v13, 0.0  ;;  %v579_v52 = vmul.f32 %v1127_v57, %v843_v2  ;;  %v584_v49 = vmul.f32 %v1150_v25, %v851_v5 }
  0x4d   :  { %271 = vrot.lane.b32.xlu2 %v260_v31, %s805_s12  ;;  %v525_v51 = vadd.f32 %v521_v27, %v516_v32  ;;  %v385_v53 = vadd.f32 %v381_v60, %v376_v42  ;;  %v593_v56 = vmul.f32 %v1160_v26, %v859_v9  ;;  %v464_v58 = vmax.f32 %v460_v7, 0.0 }
  0x4e   :  { %v518_v55 = vadd.f32 %v514_v47, %v509_v36  ;;  %v588_v30 = vadd.f32 %v584_v49, %v579_v52  ;;  %v436_v18 = vmul.f32 %v1057_v59, %v841_v1  ;;  %v441_v61 = vmul.f32 %v1064_v11, %v849_v4 }
  0x4f   :  { %v329_v24 = vmin.f32 %v325_v41, 1.0  ;;  %v390_v63 = vadd.f32 %v1022_v23, %v385_v53  ;;  %v450_v12 = vmul.f32 %v1078_v17, %v857_v8  ;;  %v578_v1 = vmul.f32 %v1127_v57, %v839_v0 }
  0x50   :  { %v527_v10 = vadd.f32 %v523_v48, %v518_v55  ;;  %v1206_v13 = vadd.f32 %v593_v56, %v588_v30  ;;  %v445_v15 = vadd.f32 %v441_v61, %v436_v18  ;;  %v583_v4 = vmul.f32 %v1150_v25, %v847_v3 }
  0x51   :  { %v528_v28 = vstv %s1155_s30  ;;  %v592_v23 = vmul.f32 %v1160_v26, %v855_v6  ;;  %v394_v16 = vmax.f32 %v390_v63, 0.0  ;;  %v439_v22 = vmul.f32 %v1057_v59, %v843_v2 }
  0x52   :  { %v454_v8 = vadd.f32 %v450_v12, %v445_v15  ;;  %v587_v21 = vadd.f32 %v583_v4, %v578_v1  ;;  %v469_v31 = vmin.f32 %v465_v46, 1.0  ;;  %v444_v32 = vmul.f32 %v1064_v11, %v851_v5 }
  0x53   :  { %v453_v39 = vmul.f32 %v1078_v17, %v859_v9  ;;  %v468_v27 = vmin.f32 %v464_v58, 1.0  ;;  %v530_v54 = vadd.f32 %v528_v28, %v525_v51  ;;  %v529_v35 = vadd.f32 %v528_v28, %v524_v29 }
  0x54   :  { %411 = vrot.lane.b32.xlu1 %v400_v34, %s805_s12  ;;  %409 = vrot.lane.b32.xlu0 %v399_v45, %s805_s12  ;;  %v596_v33 = vadd.f32 %v592_v23, %v587_v21  ;;  %v508_v34 = vmul.f32 %v1109_v43, %v839_v0  ;;  %v448_v37 = vadd.f32 %v444_v32, %v439_v22  ;;  %v398_v5 = vmin.f32 %v394_v16, 1.0 }
  0x55   :  { %339 = vrot.lane.b32.xlu2 %v329_v24, %s805_s12  ;;  %v513_v2 = vmul.f32 %v1112_v44, %v847_v3  ;;  %v522_v59 = vmul.f32 %v1119_v50, %v855_v6  ;;  %v459_v9 = vadd.f32 %v1103_v40, %v454_v8  ;;  %v577_v11 = vmul.f32 %v1127_v57, %v866_v14 }
  0x56   :  { %v457_v0 = vadd.f32 %v453_v39, %v448_v37  ;;  %v582_v3 = vmul.f32 %v1150_v25, %v871_v19  ;;  %v591_v6 = vmul.f32 %v1160_v26, %v873_v20  ;;  %v534_v43 = vmax.f32 %v530_v54, 0.0 }
  0x57   :  { %v517_v17 = vadd.f32 %v513_v2, %v508_v34  ;;  %v533_v44 = vmax.f32 %v529_v35, 0.0  ;;  %v598_v57 = vstv %s1201_s7  ;;  %v463_v29 = vmax.f32 %v459_v9, 0.0 }
  0x58   :  { %v586_v50 = vadd.f32 %v582_v3, %v577_v11  ;;  %v75_v7 = vstv %s74_s28  ;;  %v538_v19 = vmin.f32 %v534_v43, 1.0  ;;  %v599_v20 = vadd.f32 %v598_v57, %v1179_v38 }
  0x59   :  { %v526_v14 = vadd.f32 %v522_v59, %v517_v17  ;;  %v537_v25 = vmin.f32 %v533_v44, 1.0  ;;  %v532_v26 = vadd.f32 %v528_v28, %v527_v10  ;;  %81 = vst.msk [vmem:[%s1600_s3 + $0xc0] sm:$0xff] %vm76_vm0, %v75_v7  ;;  %v467_v41 = vmin.f32 %v463_v29, 1.0 }
  0x5a   :  { %v595_v62 = vadd.f32 %v591_v6, %v586_v50  ;;  %82 = vst.msk [vmem:[%s1600_s3 + $0xc8] sm:$0xff] %vm76_vm0, %v75_v7  ;;  %v462_v60 = vadd.f32 %v1103_v40, %v457_v0  ;;  %v603_v36 = vmax.f32 %v599_v20, 0.0  ;;  %v602_v48 = vadd.f32 %v598_v57, %v1206_v13 }
  0x5b   :  { %77 = vst.msk [vmem:[%s1600_s3] sm:$0xff] %vm76_vm0, %v75_v7  ;;  %v536_v38 = vmax.f32 %v532_v26, 0.0  ;;  %v601_v45 = vadd.f32 %v598_v57, %v596_v33  ;;  %v531_v52 = vadd.f32 %v528_v28, %v526_v14  ;;  %v147_v24 = vstv %s146_s27 }
  0x5c   :  { %479 = vrot.lane.b32.xlu1 %v469_v31, %s805_s12  ;;  %477 = vrot.lane.b32.xlu0 %v468_v27, %s805_s12  ;;  %78 = vst.msk [vmem:[%s1600_s3 + $0x8] sm:$0xff] %vm76_vm0, %v75_v7  ;;  %v466_v42 = vmax.f32 %v462_v60, 0.0  ;;  %v607_v40 = vmin.f32 %v603_v36, 1.0  ;;  %v606_v49 = vmax.f32 %v602_v48, 0.0  ;;  %v600_v30 = vadd.f32 %v598_v57, %v595_v62 }
  0x5d   :  { %407 = vrot.lane.b32.xlu2 %v398_v5, %s805_s12  ;;  %v540_v47 = vmin.f32 %v536_v38, 1.0  ;;  %v605_v51 = vmax.f32 %v601_v45, 0.0  ;;  %v535_v53 = vmax.f32 %v531_v52, 0.0  ;;  %83 = vst.msk [vmem:[%s1600_s3 + $0xd0] sm:$0x3] %vm79_vm1, %v75_v7  ;;  %v287_v12 = vstv %s286_s4 }
  0x5e   :  { %v470_v46 = vmin.f32 %v466_v42, 1.0  ;;  %v610_v55 = vmin.f32 %v606_v49, 1.0  ;;  %v604_v18 = vmax.f32 %v600_v30, 0.0  ;;  %80 = vst.msk [vmem:[%s1600_s3 + $0x10] sm:$0x3] %vm79_vm1, %v75_v7  ;;  %v427_v31 = vstv %s1153_s29 }
  0x5f   :  { %v609_v56 = vmin.f32 %v605_v51, 1.0  ;;  %v539_v58 = vmin.f32 %v535_v53, 1.0  ;;  %644 = vst.msk [vmem:[%s1600_s3 + $0x18] sm:$0xff] %vm76_vm0, %v147_v24  ;;  %v497_v54 = vstv %s1199_s6  ;;  %v567_v37 = vstv %s1238_s10 }
  0x60   :  { %v608_v61 = vmin.f32 %v604_v18, 1.0  ;;  %645 = vst.msk [vmem:[%s1600_s3 + $0x20] sm:$0xff] %vm76_vm0, %v147_v24 }
  0x61   :  { %646 = vst.msk [vmem:[%s1600_s3 + $0x28] sm:$0x3] %vm79_vm1, %v147_v24 }
  0x62   :  { %647 = vst.msk [vmem:[%s1600_s3 + $0xd8] sm:$0xff] %vm76_vm0, %v147_v24 }
  0x63   :  { %648 = vst.msk [vmem:[%s1600_s3 + $0xe0] sm:$0xff] %vm76_vm0, %v147_v24 }
  0x64   :  { %547 = vrot.lane.b32.xlu1 %v538_v19, %s805_s12  ;;  %545 = vrot.lane.b32.xlu0 %v537_v25, %s805_s12  ;;  %649 = vst.msk [vmem:[%s1600_s3 + $0xe8] sm:$0x3] %vm79_vm1, %v147_v24 }
  0x65   :  { %475 = vrot.lane.b32.xlu2 %v467_v41, %s805_s12  ;;  %673 = vst.msk [vmem:[%s1600_s3 + $0x50] sm:$0xff] %vm76_vm0, %v287_v12 }
  0x66   :  { %674 = vst.msk [vmem:[%s1600_s3 + $0x58] sm:$0x3] %vm79_vm1, %v287_v12 }
  0x67   :  { %672 = vst.msk [vmem:[%s1600_s3 + $0x48] sm:$0xff] %vm76_vm0, %v287_v12 }
  0x68   :  { %675 = vst.msk [vmem:[%s1600_s3 + $0x108] sm:$0xff] %vm76_vm0, %v287_v12 }
  0x69   :  { %676 = vst.msk [vmem:[%s1600_s3 + $0x110] sm:$0xff] %vm76_vm0, %v287_v12 }
  0x6a   :  { %677 = vst.msk [vmem:[%s1600_s3 + $0x118] sm:$0x3] %vm79_vm1, %v287_v12 }
  0x6b   :  { %703 = vst.msk [vmem:[%s1600_s3 + $0x138] sm:$0xff] %vm76_vm0, %v427_v31 }
  0x6c   :  { %615 = vrot.lane.b32.xlu1 %v607_v40, %s805_s12  ;;  %551 = vrot.lane.b32.xlu0 %v540_v47, %s805_s12  ;;  %704 = vst.msk [vmem:[%s1600_s3 + $0x140] sm:$0xff] %vm76_vm0, %v427_v31 }
  0x6d   :  { %481 = vrot.lane.b32.xlu2 %v470_v46, %s805_s12  ;;  %700 = vst.msk [vmem:[%s1600_s3 + $0x78] sm:$0xff] %vm76_vm0, %v427_v31 }
  0x6e   :  { %701 = vst.msk [vmem:[%s1600_s3 + $0x80] sm:$0xff] %vm76_vm0, %v427_v31 }
  0x6f   :  { %702 = vst.msk [vmem:[%s1600_s3 + $0x88] sm:$0x3] %vm79_vm1, %v427_v31 }
  0x70   :  { %705 = vst.msk [vmem:[%s1600_s3 + $0x148] sm:$0x3] %vm79_vm1, %v427_v31 }
  0x71   :  { %715 = vst.msk [vmem:[%s1600_s3 + $0x98] sm:$0xff] %vm76_vm0, %v497_v54 }
  0x72   :  { %716 = vst.msk [vmem:[%s1600_s3 + $0xa0] sm:$0x3] %vm79_vm1, %v497_v54 }
  0x73   :  { %714 = vst.msk [vmem:[%s1600_s3 + $0x90] sm:$0xff] %vm76_vm0, %v497_v54 }
  0x74   :  { %621 = vrot.lane.b32.xlu1 %v610_v55, %s805_s12  ;;  %619 = vrot.lane.b32.xlu0 %v609_v56, %s805_s12  ;;  %717 = vst.msk [vmem:[%s1600_s3 + $0x150] sm:$0xff] %vm76_vm0, %v497_v54 }
  0x75   :  { %549 = vrot.lane.b32.xlu2 %v539_v58, %s805_s12  ;;  %718 = vst.msk [vmem:[%s1600_s3 + $0x158] sm:$0xff] %vm76_vm0, %v497_v54 }
  0x76   :  { %719 = vst.msk [vmem:[%s1600_s3 + $0x160] sm:$0x3] %vm79_vm1, %v497_v54 }
  0x77   :  { %728 = vst.msk [vmem:[%s1600_s3 + $0xa8] sm:$0xff] %vm76_vm0, %v567_v37 }
  0x78   :  { %729 = vst.msk [vmem:[%s1600_s3 + $0xb0] sm:$0xff] %vm76_vm0, %v567_v37 }
  0x79   :  { %730 = vst.msk [vmem:[%s1600_s3 + $0xb8] sm:$0x3] %vm79_vm1, %v567_v37 }
  0x7a   :  { %731 = vst.msk [vmem:[%s1600_s3 + $0x168] sm:$0xff] %vm76_vm0, %v567_v37 }
  0x7b   :  { %732 = vst.msk [vmem:[%s1600_s3 + $0x170] sm:$0xff] %vm76_vm0, %v567_v37 }
  0x7c   :  { %733 = vst.msk [vmem:[%s1600_s3 + $0x178] sm:$0x3] %vm79_vm1, %v567_v37 }
  0x7d   :  { %617 = vrot.lane.b32.xlu2 %v608_v61, %s805_s12  ;;  %s215_s12 = smax.f32 %s806_s26, %s917_s11 }
  0x7e   :  { %s216_s20 = smin.f32 %s807_s2, %s215_s12  ;;  %s355_s12 = smax.f32 %s806_s26, %s983_s17 }
  0x7f   :  { %v217_v63 = vstv %s216_s20  ;;  %s356_s22 = smin.f32 %s807_s2, %s355_s12 }
  0x80   :  { %661 = vst.msk [vmem:[%s1600_s3 + $0xf0] sm:$0xff] %vm76_vm0, %v217_v63  ;;  %v357_v4 = vstv %s356_s22 }
  0x81   :  { %662 = vst.msk [vmem:[%s1600_s3 + $0xf8] sm:$0xff] %vm76_vm0, %v217_v63 }
  0x82   :  { %658 = vst.msk [vmem:[%s1600_s3 + $0x30] sm:$0xff] %vm76_vm0, %v217_v63 }
  0x83   :  { %659 = vst.msk [vmem:[%s1600_s3 + $0x38] sm:$0xff] %vm76_vm0, %v217_v63 }
  0x84   :  { %660 = vst.msk [vmem:[%s1600_s3 + $0x40] sm:$0x3] %vm79_vm1, %v217_v63 }
  0x85   :  { %663 = vst.msk [vmem:[%s1600_s3 + $0x100] sm:$0x3] %vm79_vm1, %v217_v63 }
  0x86   :  { %686 = vst.msk [vmem:[%s1600_s3 + $0x60] sm:$0xff] %vm76_vm0, %v357_v4 }
  0x87   :  { %687 = vst.msk [vmem:[%s1600_s3 + $0x68] sm:$0xff] %vm76_vm0, %v357_v4 }
  0x88   :  { %688 = vst.msk [vmem:[%s1600_s3 + $0x70] sm:$0x3] %vm79_vm1, %v357_v4 }
  0x89   :  { %689 = vst.msk [vmem:[%s1600_s3 + $0x120] sm:$0xff] %vm76_vm0, %v357_v4 }
  0x8a   :  { %690 = vst.msk [vmem:[%s1600_s3 + $0x128] sm:$0xff] %vm76_vm0, %v357_v4 }
  0x8b   :  { %691 = vst.msk [vmem:[%s1600_s3 + $0x130] sm:$0x3] %vm79_vm1, %v357_v4 }
  0x8f   :  { %v196_v10 = vpop.permute.xlu2 %195 }
  0x90   :  { %650 = vst.msk [vmem:[%s1600_s3 + $0x19] sm:$0xff] %vm136_vm2, %v196_v10 }
  0x96   :  { %v129_v13 = vpop.permute.xlu1 %128  ;;  %v125_v15 = vpop.permute.xlu0 %124 }
  0x97   :  { %139 = vst.msk [vmem:[%s1600_s3 + $0xc1] sm:$0xff] %vm136_vm2, %v129_v13  ;;  %v198_v1 = vpop.permute.xlu2 %197 }
  0x98   :  { %137 = vst.msk [vmem:[%s1600_s3 + $0x1] sm:$0xff] %vm136_vm2, %v125_v15 }
  0x99   :  { %651 = vst.msk [vmem:[%s1600_s3 + $0x21] sm:$0xff] %vm136_vm2, %v198_v1 }
  0x9e   :  { %v131_v28 = vpop.permute.xlu1 %130  ;;  %v127_v23 = vpop.permute.xlu0 %126 }
  0x9f   :  { %140 = vst.msk [vmem:[%s1600_s3 + $0xc9] sm:$0xff] %vm136_vm2, %v131_v28  ;;  %v266_v16 = vpop.permute.xlu2 %265 }
  0xa0   :  { %138 = vst.msk [vmem:[%s1600_s3 + $0x9] sm:$0xff] %vm136_vm2, %v127_v23 }
  0xa1   :  { %664 = vst.msk [vmem:[%s1600_s3 + $0x31] sm:$0xff] %vm136_vm2, %v266_v16 }
  0xa6   :  { %v202_v8 = vpop.permute.xlu1 %201  ;;  %v200_v21 = vpop.permute.xlu0 %199 }
  0xa7   :  { %653 = vst.msk [vmem:[%s1600_s3 + $0xe1] sm:$0xff] %vm136_vm2, %v202_v8  ;;  %v272_v22 = vpop.permute.xlu2 %271 }
  0xa8   :  { %652 = vst.msk [vmem:[%s1600_s3 + $0xd9] sm:$0xff] %vm136_vm2, %v200_v21 }
  0xa9   :  { %667 = vst.msk [vmem:[%s1600_s3 + $0xf9] sm:$0xff] %vm136_vm2, %v272_v22 }
  0xae   :  { %v270_v32 = vpop.permute.xlu1 %269  ;;  %v268_v39 = vpop.permute.xlu0 %267 }
  0xaf   :  { %666 = vst.msk [vmem:[%s1600_s3 + $0xf1] sm:$0xff] %vm136_vm2, %v270_v32  ;;  %v340_v27 = vpop.permute.xlu2 %339 }
  0xb0   :  { %665 = vst.msk [vmem:[%s1600_s3 + $0x39] sm:$0xff] %vm136_vm2, %v268_v39 }
  0xb1   :  { %680 = vst.msk [vmem:[%s1600_s3 + $0x109] sm:$0xff] %vm136_vm2, %v340_v27 }
  0xb6   :  { %v338_v33 = vpop.permute.xlu1 %337  ;;  %v336_v34 = vpop.permute.xlu0 %335 }
  0xb7   :  { %679 = vst.msk [vmem:[%s1600_s3 + $0x51] sm:$0xff] %vm136_vm2, %v338_v33  ;;  %v408_v35 = vpop.permute.xlu2 %407 }
  0xb8   :  { %678 = vst.msk [vmem:[%s1600_s3 + $0x49] sm:$0xff] %vm136_vm2, %v336_v34 }
  0xb9   :  { %693 = vst.msk [vmem:[%s1600_s3 + $0x69] sm:$0xff] %vm136_vm2, %v408_v35 }
  0xbe   :  { %v406_v2 = vpop.permute.xlu1 %405  ;;  %v342_v59 = vpop.permute.xlu0 %341 }
  0xbf   :  { %692 = vst.msk [vmem:[%s1600_s3 + $0x61] sm:$0xff] %vm136_vm2, %v406_v2  ;;  %v476_v5 = vpop.permute.xlu2 %475 }
  0xc0   :  { %681 = vst.msk [vmem:[%s1600_s3 + $0x111] sm:$0xff] %vm136_vm2, %v342_v59 }
  0xc1   :  { %706 = vst.msk [vmem:[%s1600_s3 + $0x79] sm:$0xff] %vm136_vm2, %v476_v5 }
  0xc6   :  { %v412_v9 = vpop.permute.xlu1 %411  ;;  %v410_v11 = vpop.permute.xlu0 %409 }
  0xc7   :  { %695 = vst.msk [vmem:[%s1600_s3 + $0x129] sm:$0xff] %vm136_vm2, %v412_v9  ;;  %v482_v0 = vpop.permute.xlu2 %481 }
  0xc8   :  { %694 = vst.msk [vmem:[%s1600_s3 + $0x121] sm:$0xff] %vm136_vm2, %v410_v11 }
  0xc9   :  { %709 = vst.msk [vmem:[%s1600_s3 + $0x141] sm:$0xff] %vm136_vm2, %v482_v0 }
  0xce   :  { %v480_v17 = vpop.permute.xlu1 %479  ;;  %v478_v3 = vpop.permute.xlu0 %477 }
  0xcf   :  { %708 = vst.msk [vmem:[%s1600_s3 + $0x139] sm:$0xff] %vm136_vm2, %v480_v17  ;;  %v550_v6 = vpop.permute.xlu2 %549 }
  0xd0   :  { %707 = vst.msk [vmem:[%s1600_s3 + $0x81] sm:$0xff] %vm136_vm2, %v478_v3 }
  0xd1   :  { %722 = vst.msk [vmem:[%s1600_s3 + $0x151] sm:$0xff] %vm136_vm2, %v550_v6 }
  0xd6   :  { %v548_v43 = vpop.permute.xlu1 %547  ;;  %v546_v44 = vpop.permute.xlu0 %545 }
  0xd7   :  { %721 = vst.msk [vmem:[%s1600_s3 + $0x99] sm:$0xff] %vm136_vm2, %v548_v43  ;;  %v618_v14 = vpop.permute.xlu2 %617 }
  0xd8   :  { %720 = vst.msk [vmem:[%s1600_s3 + $0x91] sm:$0xff] %vm136_vm2, %v546_v44 }
  0xd9   :  { %735 = vst.msk [vmem:[%s1600_s3 + $0xb1] sm:$0xff] %vm136_vm2, %v618_v14 }
  0xde   :  { %v616_v50 = vpop.permute.xlu1 %615  ;;  %v552_v57 = vpop.permute.xlu0 %551 }
  0xdf   :  { %734 = vst.msk [vmem:[%s1600_s3 + $0xa9] sm:$0xff] %vm136_vm2, %v616_v50 }
  0xe0   :  { %723 = vst.msk [vmem:[%s1600_s3 + $0x159] sm:$0xff] %vm136_vm2, %v552_v57 }
  0xe6   :  { %v622_v29 = vpop.permute.xlu1 %621  ;;  %v620_v62 = vpop.permute.xlu0 %619 }
  0xe7   :  { %737 = vst.msk [vmem:[%s1600_s3 + $0x171] sm:$0xff] %vm136_vm2, %v622_v29 }
  0xe8   :  { %736 = vst.msk [vmem:[%s1600_s3 + $0x169] sm:$0xff] %vm136_vm2, %v620_v62 }
  0xe9   :  { %635 = vsyncpa [#allocation3], 1 }
  0xea   :  { %636 = vsyncpa [#allocation4], 1 }
  0xeb   :  { %637 = vsyncpa [#allocation6], 1 }

</bundles_post_ra>
